<compile_context>
chip_gen: v7x
topology: tpu7x:2x2x1
jax: 0.10.0
libtpu: 0.0.40
codegen_flags: <defaults>
</compile_context>

<pallas_src>
import functools

import jax
import jax.numpy as jnp
from jax.experimental import pallas as pl
from jax.experimental.pallas import tpu as pltpu


_NEG_LARGE = -1e30  # finite "-inf" for padded vocab columns (bias padding)


def _round_up(x, m):
    return ((x + m - 1) // m) * m


def _cdiv(a, b):
    return (a + b - 1) // b


def _generator_kernel(x_ref, w_ref, b_ref, logits_ref, lse_ref, m_sc, l_sc):
    """Single-pass fused Linear + online logsumexp.

    grid = (row_tiles, vocab_tiles). Each step computes one (tm, tn) logits
    tile on the MXU (bf16 in, f32 acc), writes it out raw, and folds it into
    the per-row running (max, sum-exp).  At the last vocab tile the per-row
    lse = m + log(l) is written; the `logits - lse` correction happens in a
    fused XLA epilogue outside the kernel.
    """
    j = pl.program_id(1)

    logits = jnp.dot(x_ref[...], w_ref[...],
                     preferred_element_type=jnp.float32) + b_ref[...]
    logits_ref[...] = logits  # raw logits (f32); corrected in the epilogue

    @pl.when(j == 0)
    def _init():
        m_sc[...] = jnp.full_like(m_sc, _NEG_LARGE)
        l_sc[...] = jnp.zeros_like(l_sc)

    m_prev = m_sc[...]
    m_new = jnp.maximum(m_prev, jnp.max(logits, axis=-1, keepdims=True))
    l_sc[...] = (l_sc[...] * jnp.exp(m_prev - m_new)
                 + jnp.sum(jnp.exp(logits - m_new), axis=-1, keepdims=True))
    m_sc[...] = m_new

    @pl.when(j == pl.num_programs(1) - 1)
    def _finalize():
        lse_ref[...] = m_sc[...] + jnp.log(l_sc[...])


@functools.partial(jax.jit, static_argnames=("d_out", "tm", "tn", "out_dtype"))
def _generator_forward(x, w_p, b_p, *, d_out, tm, tn, out_dtype):
    """log_softmax(x @ W^T + b) given a pre-prepared (d_in_p, d_out_p) bf16 W."""
    orig_shape = x.shape
    d_in = orig_shape[-1]
    d_in_p, d_out_p = w_p.shape
    out_dtype = jnp.dtype(x.dtype if out_dtype is None else out_dtype)

    x2 = x.reshape(-1, d_in)
    n = x2.shape[0]
    tm_eff = min(tm, _round_up(n, 16))          # no divisibility assert
    n_p = _round_up(n, tm_eff)
    x_p = jnp.pad(x2.astype(jnp.bfloat16), ((0, n_p - n), (0, d_in_p - d_in)))

    grid_i = n_p // tm_eff
    grid_j = d_out_p // tn

    # VMEM budget from the actual block sizes (x2 for double buffering),
    # plus scratch and headroom; never rely on the 16/32 MiB default limits.
    block_bytes = (tm_eff * d_in_p * 2        # x tile (bf16)
                   + d_in_p * tn * 2          # weight tile (bf16)
                   + 8 * tn * 4               # bias tile (f32, sublane-padded)
                   + tm_eff * tn * 4          # logits tile (f32)
                   + tm_eff * 128 * 4)        # lse tile (f32, lane-padded)
    vmem_limit = int(min(112 << 20,
                         max(32 << 20,
                             2 * block_bytes + 2 * tm_eff * 128 * 4 + (16 << 20))))

    cost = pl.CostEstimate(
        flops=2 * n_p * d_in_p * d_out_p,                 # single matmul pass
        transcendentals=n_p * d_out_p,
        bytes_accessed=(2 * x_p.size                      # bf16 activations
                        + grid_i * 2 * w_p.size           # weight per row tile
                        + grid_i * 4 * b_p.size
                        + 4 * n_p * d_out_p               # raw logits writeback
                        + 4 * n_p),                       # lse
    )

    logits, lse = pl.pallas_call(
        _generator_kernel,
        out_shape=(jax.ShapeDtypeStruct((n_p, d_out_p), jnp.float32),
                   jax.ShapeDtypeStruct((n_p, 1), jnp.float32)),
        grid_spec=pltpu.PrefetchScalarGridSpec(
            num_scalar_prefetch=0,
            grid=(grid_i, grid_j),
            in_specs=[
                pl.BlockSpec((tm_eff, d_in_p), lambda i, j: (i, 0)),
                pl.BlockSpec((d_in_p, tn), lambda i, j: (0, j)),
                pl.BlockSpec((1, tn), lambda i, j: (0, j)),
            ],
            out_specs=[
                pl.BlockSpec((tm_eff, tn), lambda i, j: (i, j)),   # raw logits
                pl.BlockSpec((tm_eff, 1), lambda i, j: (i, 0)),    # per-row lse
            ],
            scratch_shapes=[
                pltpu.VMEM((tm_eff, 1), jnp.float32),   # running max m
                pltpu.VMEM((tm_eff, 1), jnp.float32),   # running sum-exp l
            ],
        ),
        compiler_params=pltpu.CompilerParams(
            dimension_semantics=("parallel", "arbitrary"),
            vmem_limit_bytes=vmem_limit,
        ),
        cost_estimate=cost,
    )(x_p, w_p, b_p)

    # Elementwise epilogue: XLA fuses the subtract, cast and de-padding slice.
    out = (logits[:n, :d_out] - lse[:n]).astype(out_dtype)
    return out.reshape(*orig_shape[:-1], d_out)


class PallasGenerator:
    """Pallas equivalent of `Generator` (nn.Linear + LogSoftmax(dim=-1)).

    Weight preprocessing (bf16 cast, one-time transpose to (d_in, d_out),
    lane padding, bias padding with ~-inf) is hoisted into __init__ so the
    per-call forward never re-streams or re-lays-out the f32 parameter.
    """

    def __init__(self, weight, bias, *, tm=512, tn=None, out_dtype=None):
        d_out, d_in = weight.shape
        self.d_out = int(d_out)
        d_in_p = _round_up(d_in, 128)
        d_out_128 = _round_up(d_out, 128)

        if tn is None:
            # Cap the bf16 weight block at ~8 MiB (fits double-buffered within
            # v7x's 64 MiB VMEM alongside x / logits tiles), then balance tiles
            # so vocab padding stays small.
            tn_cap = min(2048, max(128, ((8 << 20) // (2 * d_in_p)) // 128 * 128))
            n_vtiles = _cdiv(d_out_128, tn_cap)
            tn = _round_up(_cdiv(d_out_128, n_vtiles), 128)
        d_out_p = _round_up(d_out_128, tn)

        self.tm = int(tm)
        self.tn = int(tn)
        self.out_dtype = out_dtype

        # One-time parameter prep (amortized across all forward calls).
        w_t = jnp.asarray(weight).astype(jnp.bfloat16).T         # (d_in, d_out)
        self.w_p = jnp.pad(w_t, ((0, d_in_p - d_in), (0, d_out_p - d_out)))
        b = jnp.asarray(bias).astype(jnp.float32).reshape(1, d_out)
        self.b_p = jnp.pad(b, ((0, 0), (0, d_out_p - d_out)),
                           constant_values=_NEG_LARGE)            # padded cols ≈ -inf

    def __call__(self, x):
        return _generator_forward(x, self.w_p, self.b_p, d_out=self.d_out,
                                  tm=self.tm, tn=self.tn, out_dtype=self.out_dtype)


def generator_forward(x, weight, bias, **kwargs):
    """One-shot convenience wrapper. Prefer PallasGenerator to hoist weight prep."""
    return PallasGenerator(weight, bias, **kwargs)(x)


if __name__ == "__main__":
    key = jax.random.PRNGKey(0)
    k_x, k_w, k_b = jax.random.split(key, 3)

    batch, seq, input_size, output_size = 2, 8, 32, 16

    x = jax.random.normal(k_x, (batch, seq, input_size), dtype=jnp.float32)
    # PyTorch nn.Linear layout: (out_features, in_features)
    weight = jax.random.normal(k_w, (output_size, input_size), dtype=jnp.float32) * 0.1
    bias = jax.random.normal(k_b, (output_size,), dtype=jnp.float32) * 0.1

    gen = PallasGenerator(weight, bias)
    y = jax.block_until_ready(gen(x))
    assert y.shape == (batch, seq, output_size)

    # Reference at matched precision (bf16 MXU inputs, f32 accumulation).
    xb = x.astype(jnp.bfloat16).astype(jnp.float32)
    wb = weight.astype(jnp.bfloat16).astype(jnp.float32)
    ref = jax.nn.log_softmax(jnp.einsum("bsd,od->bso", xb, wb) + bias, axis=-1)
    assert jnp.allclose(y, ref, atol=1e-4, rtol=1e-4), "mismatch vs matched-precision ref"

    # Coarse check vs full-f32 reference (bf16 cast introduces ~1e-2 error).
    ref_f32 = jax.nn.log_softmax(jnp.einsum("bsd,od->bso", x, weight) + bias, axis=-1)
    assert jnp.allclose(y, ref_f32, atol=5e-2, rtol=5e-2), "mismatch vs f32 reference"

    print("KERNEL_OK")
</pallas_src>

<mosaic_0001>
module attributes {stable_mosaic.version = 11 : i64} {
  func.func @_generator_kernel(%arg0: i32, %arg1: i32, %arg2: memref<16x128xbf16, #tpu.memory_space<vmem>>, %arg3: memref<128x128xbf16, #tpu.memory_space<vmem>>, %arg4: memref<1x128xf32, #tpu.memory_space<vmem>>, %arg5: memref<16x128xf32, #tpu.memory_space<vmem>>, %arg6: memref<16x1xf32, #tpu.memory_space<vmem>>, %arg7: memref<16x1xf32, #tpu.memory_space<vmem>>, %arg8: memref<16x1xf32, #tpu.memory_space<vmem>>) attributes {dimension_semantics = [#tpu.dimension_semantics<parallel>, #tpu.dimension_semantics<arbitrary>], iteration_bounds = array<i64: 1, 1>, scalar_prefetch = 0 : i64, scratch_operands = 2 : i64, tpu.core_type = #tpu.core_type<tc>, window_params = [{transform_indices = @transform_0, window_bounds = array<i64: 16, 128>}, {transform_indices = @transform_1, window_bounds = array<i64: 128, 128>}, {transform_indices = @transform_2, window_bounds = array<i64: 1, 128>}, {transform_indices = @transform_3, window_bounds = array<i64: 16, 128>}, {transform_indices = @transform_4, window_bounds = array<i64: 16, 1>}]} {
    %c0 = arith.constant 0 : index
    %c0_0 = arith.constant 0 : index
    %0 = vector.load %arg2[%c0, %c0_0] : memref<16x128xbf16, #tpu.memory_space<vmem>>, vector<16x128xbf16>
    %c0_1 = arith.constant 0 : index
    %c0_2 = arith.constant 0 : index
    %1 = vector.load %arg3[%c0_1, %c0_2] : memref<128x128xbf16, #tpu.memory_space<vmem>>, vector<128x128xbf16>
    %cst = arith.constant dense<0.000000e+00> : vector<16x128xf32>
    %2 = tpu.matmul %0, %1, %cst {dimension_numbers = #tpu.dot_dimension_numbers<[1], [0], [0], [1], [0, 0, 1, 1], [], []>} : vector<16x128xbf16>, vector<128x128xbf16>, vector<16x128xf32> -> vector<16x128xf32>
    %c0_3 = arith.constant 0 : index
    %c0_4 = arith.constant 0 : index
    %3 = vector.load %arg4[%c0_3, %c0_4] : memref<1x128xf32, #tpu.memory_space<vmem>>, vector<1x128xf32>
    %4 = vector.broadcast %3 : vector<1x128xf32> to vector<16x128xf32>
    %5 = arith.addf %2, %4 : vector<16x128xf32>
    %c0_5 = arith.constant 0 : index
    %c0_6 = arith.constant 0 : index
    %6 = vector.load %arg5[%c0_5, %c0_6] : memref<16x128xf32, #tpu.memory_space<vmem>>, vector<16x128xf32>
    tpu.vector_store %arg5[%c0_5, %c0_6], %5 {strides = array<i32>} : memref<16x128xf32, #tpu.memory_space<vmem>>, vector<16x128xf32>,
    %c0_i32 = arith.constant 0 : i32
    %7 = arith.cmpi eq, %arg1, %c0_i32 : i32
    %8 = arith.extui %7 : i1 to i32
    %c0_i32_7 = arith.constant 0 : i32
    %9 = arith.cmpi ne, %8, %c0_i32_7 : i32
    scf.if %9 {
      %cst_20 = arith.constant -1.000000e+30 : f32
      %29 = vector.broadcast %cst_20 : f32 to vector<16x1xf32>
      %c0_21 = arith.constant 0 : index
      %c0_22 = arith.constant 0 : index
      %30 = vector.load %arg7[%c0_21, %c0_22] : memref<16x1xf32, #tpu.memory_space<vmem>>, vector<16x1xf32>
      tpu.vector_store %arg7[%c0_21, %c0_22], %29 {strides = array<i32>} : memref<16x1xf32, #tpu.memory_space<vmem>>, vector<16x1xf32>,
      %cst_23 = arith.constant 0.000000e+00 : f32
      %31 = vector.broadcast %cst_23 : f32 to vector<16x1xf32>
      %c0_24 = arith.constant 0 : index
      %c0_25 = arith.constant 0 : index
      %32 = vector.load %arg8[%c0_24, %c0_25] : memref<16x1xf32, #tpu.memory_space<vmem>>, vector<16x1xf32>
      tpu.vector_store %arg8[%c0_24, %c0_25], %31 {strides = array<i32>} : memref<16x1xf32, #tpu.memory_space<vmem>>, vector<16x1xf32>,
    } else {
    }
    %c0_8 = arith.constant 0 : index
    %c0_9 = arith.constant 0 : index
    %10 = vector.load %arg7[%c0_8, %c0_9] : memref<16x1xf32, #tpu.memory_space<vmem>>, vector<16x1xf32>
    %cst_10 = arith.constant dense<0xFF800000> : vector<16xf32>
    %11 = vector.multi_reduction <maximumf>, %5, %cst_10 [1] : vector<16x128xf32> to vector<16xf32>
    %12 = vector.shape_cast %11 : vector<16xf32> to vector<16x1xf32>
    %13 = arith.maximumf %10, %12 : vector<16x1xf32>
    %c0_11 = arith.constant 0 : index
    %c0_12 = arith.constant 0 : index
    %14 = vector.load %arg8[%c0_11, %c0_12] : memref<16x1xf32, #tpu.memory_space<vmem>>, vector<16x1xf32>
    %15 = arith.subf %10, %13 : vector<16x1xf32>
    %16 = math.exp %15 : vector<16x1xf32>
    %17 = arith.mulf %14, %16 : vector<16x1xf32>
    %18 = vector.broadcast %13 : vector<16x1xf32> to vector<16x128xf32>
    %19 = arith.subf %5, %18 : vector<16x128xf32>
    %20 = math.exp %19 : vector<16x128xf32>
    %cst_13 = arith.constant dense<0.000000e+00> : vector<16xf32>
    %21 = vector.multi_reduction <add>, %20, %cst_13 [1] : vector<16x128xf32> to vector<16xf32>
    %22 = vector.shape_cast %21 : vector<16xf32> to vector<16x1xf32>
    %23 = arith.addf %17, %22 : vector<16x1xf32>
    %c0_14 = arith.constant 0 : index
    %c0_15 = arith.constant 0 : index
    %24 = vector.load %arg8[%c0_14, %c0_15] : memref<16x1xf32, #tpu.memory_space<vmem>>, vector<16x1xf32>
    tpu.vector_store %arg8[%c0_14, %c0_15], %23 {strides = array<i32>} : memref<16x1xf32, #tpu.memory_space<vmem>>, vector<16x1xf32>,
    %c0_16 = arith.constant 0 : index
    %c0_17 = arith.constant 0 : index
    %25 = vector.load %arg7[%c0_16, %c0_17] : memref<16x1xf32, #tpu.memory_space<vmem>>, vector<16x1xf32>
    tpu.vector_store %arg7[%c0_16, %c0_17], %13 {strides = array<i32>} : memref<16x1xf32, #tpu.memory_space<vmem>>, vector<16x1xf32>,
    %c0_i32_18 = arith.constant 0 : i32
    %26 = arith.cmpi eq, %arg1, %c0_i32_18 : i32
    %27 = arith.extui %26 : i1 to i32
    %c0_i32_19 = arith.constant 0 : i32
    %28 = arith.cmpi ne, %27, %c0_i32_19 : i32
    scf.if %28 {
      %c0_20 = arith.constant 0 : index
      %c0_21 = arith.constant 0 : index
      %29 = vector.load %arg7[%c0_20, %c0_21] : memref<16x1xf32, #tpu.memory_space<vmem>>, vector<16x1xf32>
      %c0_22 = arith.constant 0 : index
      %c0_23 = arith.constant 0 : index
      %30 = vector.load %arg8[%c0_22, %c0_23] : memref<16x1xf32, #tpu.memory_space<vmem>>, vector<16x1xf32>
      %31 = math.log %30 : vector<16x1xf32>
      %32 = arith.addf %29, %31 : vector<16x1xf32>
      %c0_24 = arith.constant 0 : index
      %c0_25 = arith.constant 0 : index
      %33 = vector.load %arg6[%c0_24, %c0_25] : memref<16x1xf32, #tpu.memory_space<vmem>>, vector<16x1xf32>
      tpu.vector_store %arg6[%c0_24, %c0_25], %32 {strides = array<i32>} : memref<16x1xf32, #tpu.memory_space<vmem>>, vector<16x1xf32>,
    } else {
    }
    return
  }
  func.func @transform_0(%arg0: i32, %arg1: i32) -> (i32, i32) {
    %c0_i32 = arith.constant 0 : i32
    %c0_i32_0 = arith.constant 0 : i32
    return %arg0, %c0_i32 : i32, i32
  }
  func.func @transform_1(%arg0: i32, %arg1: i32) -> (i32, i32) {
    %c0_i32 = arith.constant 0 : i32
    %c0_i32_0 = arith.constant 0 : i32
    return %c0_i32, %arg1 : i32, i32
  }
  func.func @transform_2(%arg0: i32, %arg1: i32) -> (i32, i32) {
    %c0_i32 = arith.constant 0 : i32
    %c0_i32_0 = arith.constant 0 : i32
    return %c0_i32, %arg1 : i32, i32
  }
  func.func @transform_3(%arg0: i32, %arg1: i32) -> (i32, i32) {
    %c0_i32 = arith.constant 0 : i32
    return %arg0, %arg1 : i32, i32
  }
  func.func @transform_4(%arg0: i32, %arg1: i32) -> (i32, i32) {
    %c0_i32 = arith.constant 0 : i32
    %c0_i32_0 = arith.constant 0 : i32
    return %arg0, %c0_i32 : i32, i32
  }
}

</mosaic_0001>

<bundles_post_ra>
// kernel: _generator_forward.1
= control target key start
LH: loop header
LB: loop body
LE: loop exit
PB: predicated region body
PF: predicated region fallthrough
CT: control target
= control target key end

     0   :  { %10 = vsyncpa [#allocation5], 0  ;;  %s324_s15 = smov [#allocation4]   ;;  %s396_s0 = inlined_call_operand.vmem [shape: bf16[16,128], index: 0, kind: input, shape index: {}]   ;;  %s397_s1 = inlined_call_operand.hbm [shape: bf16[128,128], index: 1, kind: input, shape index: {}]   ;;  %s398_s2 = inlined_call_operand.vmem [shape: f32[1,128], index: 2, kind: input, shape index: {}]   ;;  %s399_s3 = inlined_call_operand.vmem [shape: f32[16,128], index: 3, kind: output, shape index: {0}]   ;;  %s400_s4 = inlined_call_operand.vmem [shape: f32[16,1], index: 4, kind: output, shape index: {1}]  }
   0x1   :  { %s18_s16 = sshll.u32 %s324_s15, 4  ;;  %s300_s19 = scalar_lea.hbm %s397_s1, 1024  ;;  %s19_s16 = int_to_ptr.vmem [resolvable:$true] %s18_s16 }
   0x2   :  { %p301_p0 = scmp.ne.s32.totalorder %s397_s1, %s300_s19  ;;  %p304_p1 = scmp.lt.u32.totalorder %s300_s19, %s397_s1 }
   0x4   :  { %p306_p2 = pnand %p304_p1, %p301_p0 }
   0x6   :  { %309 = shalt.err (!%p306_p2)
}
   0x7   :  { %s310_s24 = scalar_lea.vmem %s19_s16, 1024  ;;  %p315_p4 = scmp.lt.s32.totalorder %s19_s16, %s19_s16 }
   0x8   :  { %p311_p3 = scmp.ne.s32.totalorder %s19_s16, %s310_s24  ;;  %p316_p5 = scmp.lt.s32.totalorder %s310_s24, %s310_s24 }
   0xa   :  { %p317_p6 = por %p316_p5, %p315_p4 }
   0xc   :  { %p318_p7 = pnand %p317_p6, %p311_p3 }
   0xe   :  { %321 = shalt.err (!%p318_p7)
}
   0xf   :  { %s325_s25 = smov 64   ;;  %s326_s26 = smov 4  }
  0x10   :  { %24 = dma.hbm_to_vmem [thread:$0]  %s397_s1, 1024, %s19_s16, [#allocation5], %s325_s25, %s325_s25, %s326_s26  }
  0x11   :  { %322 = dma.done.wait [#allocation5], 1024  }
  0x12   :  { %323 = vsyncadd [#allocation5], 4294966272  ;;  %v327_v0 = vmov 0.0   ;;  %vm328_vm0 = vmmov 0   ;;  %v279_v1 = vld [vmem:[#allocation4] sm:$0xff]   ;;  %v280_v2 = vld [vmem:[#allocation4 + $0x8] sm:$0xff]  }
  0x13   :  { %250 = vmatprep.subr.bf16.mxu0 %v327_v0  ;;  %266 = vmatprep.mubr.msk.bf16.mxu0 %vm328_vm0, %v327_v0  ;;  %v281_v3 = vld [vmem:[#allocation4 + $0x10] sm:$0xff]   ;;  %v282_v4 = vld [vmem:[#allocation4 + $0x18] sm:$0xff]   ;;  %v283_v5 = vld [vmem:[#allocation4 + $0x20] sm:$0xff]   ;;  %vm157_vm1 = vcmask 7168   ;;  %v329_v10 = vmov -1e+30  }
  0x14   :  { %251 = vmatpush3.bf16.msra.mxu0 %v279_v1  ;;  %v284_v6 = vld [vmem:[#allocation4 + $0x28] sm:$0xff]   ;;  %v285_v7 = vld [vmem:[#allocation4 + $0x30] sm:$0xff]   ;;  %v286_v8 = vld [vmem:[#allocation4 + $0x38] sm:$0xff]   ;;  %158 = vst.msk [vmem:[#allocation2] sm:$0xff] %vm157_vm1, %v329_v10  ;;  %v330_v18 = vmov 0  }
  0x15   :  { %252 = vmatprep.subr.bf16.mxu0 %v327_v0  ;;  %v287_v9 = vld [vmem:[%s396_s0] sm:$0xff]   ;;  %159 = vst.msk [vmem:[#allocation2 + $0x8] sm:$0xff] %vm157_vm1, %v329_v10  ;;  %160 = vst.msk [vmem:[#allocation3] sm:$0xff] %vm157_vm1, %v327_v0  ;;  %277 = vset.pattern.permute.xlu1 %v330_v18 }
  0x16   :  { %161 = vst.msk [vmem:[#allocation3 + $0x8] sm:$0xff] %vm157_vm1, %v327_v0  ;;  %v231_v11 = vld [vmem:[%s398_s2] ss:$0 sm:$0xff]  ;;  %278 = vset.pattern.permute.xlu0 %v330_v18 }
  0x18   :  { %253 = vmatpush3.bf16.msra.mxu0 %v280_v2 }
  0x19   :  { %254 = vmatprep.subr.bf16.mxu0 %v327_v0 }
  0x1b   :  { %v162_v19 = vld [vmem:[#allocation2] sm:$0xff] }
  0x1c   :  { %255 = vmatpush3.bf16.msra.mxu0 %v281_v3  ;;  %v163_v22 = vld [vmem:[#allocation2 + $0x8] sm:$0xff]  ;;  %v170_v38 = vld [vmem:[#allocation3] sm:$0xff] }
  0x1d   :  { %256 = vmatprep.subr.bf16.mxu0 %v327_v0  ;;  %v171_v42 = vld [vmem:[#allocation3 + $0x8] sm:$0xff] }
  0x20   :  { %257 = vmatpush3.bf16.msra.mxu0 %v282_v4 }
  0x21   :  { %258 = vmatprep.subr.bf16.mxu0 %v327_v0 }
  0x24   :  { %259 = vmatpush3.bf16.msra.mxu0 %v283_v5 }
  0x25   :  { %260 = vmatprep.subr.bf16.mxu0 %v327_v0 }
  0x28   :  { %261 = vmatpush3.bf16.msra.mxu0 %v284_v6 }
  0x29   :  { %262 = vmatprep.subr.bf16.mxu0 %v327_v0 }
  0x2c   :  { %263 = vmatpush3.bf16.msra.mxu0 %v285_v7 }
  0x2d   :  { %264 = vmatprep.subr.bf16.mxu0 %v327_v0 }
  0x30   :  { %265 = vmatpush3.bf16.msra.mxu0 %v286_v8 }
  0x33   :  { %267 = vmatmul.mubr.bf16.vlgmr.msra.gmra.mrb[0].mxu0 %v287_v9 }
 0x106   :  { %v144_v12 = vpop.f32.mrb[0].mxu0 }
 0x107   :  { %v145_v13 = vadd.f32 %v231_v11, %v144_v12  ;;  %v268_v14 = vpop.f32.mrb[1].mxu0 }
 0x108   :  { %v147_v15 = vpop.f32.mrb[2].mxu0 }
 0x109   :  { %151 = vst [vmem:[%s399_s3] sm:$0xff] %v145_v13  ;;  %v148_v16 = vadd.f32 %v231_v11, %v147_v15  ;;  %164 = vmax.xlane.f32.xlu0 %v145_v13  ;;  %v269_v17 = vpop.f32.mrb[3].mxu0 }
 0x10b   :  { %152 = vst [vmem:[%s399_s3 + $0x8] sm:$0xff] %v148_v16 }
 0x10d   :  { %166 = vmax.xlane.f32.xlu0 %v148_v16 }
 0x196   :  { %v165_v20 = vpop.xlane.xlu0 %164 }
 0x197   :  { %v168_v21 = vmax.f32 %v162_v19, %v165_v20 }
 0x199   :  { %v172_v23 = vsub.f32 %v162_v19, %v168_v21  ;;  %205 = vst.msk [vmem:[#allocation2] sm:$0xff] %vm157_vm1, %v168_v21  ;;  %182 = vperm.xlu1 %277, %v168_v21  }
 0x19a   :  { %v167_v24 = vpop.xlane.xlu0 %166 }
 0x19b   :  { %v169_v25 = vmax.f32 %v163_v22, %v167_v24  ;;  %v174_v35 = vmul.f32 1.442695, %v172_v23 }
 0x19d   :  { %v173_v26 = vsub.f32 %v163_v22, %v169_v25  ;;  %206 = vst.msk [vmem:[#allocation2 + $0x8] sm:$0xff] %vm157_vm1, %v169_v25  ;;  %187 = vperm.xlu1 %277, %v169_v25  }
 0x19f   :  { %v176_v36 = vmul.f32 1.442695, %v173_v26 }
 0x1a0   :  { %v210_v51 = vld [vmem:[#allocation2] sm:$0xff] }
 0x1a4   :  { %v211_v55 = vld [vmem:[#allocation2 + $0x8] sm:$0xff] }
 0x218   :  { %v183_v27 = vpop.permute.xlu1 %182 }
 0x219   :  { %v190_v28 = vsub.f32 %v145_v13, %v183_v27 }
 0x21b   :  { %v192_v29 = vmul.f32 1.442695, %v190_v28 }
 0x21c   :  { %v188_v30 = vpop.permute.xlu1 %187 }
 0x21d   :  { %288 = vpow2.f32 %v192_v29  ;;  %v191_v31 = vsub.f32 %v148_v16, %v188_v30 }
 0x21f   :  { %v194_v32 = vmul.f32 1.442695, %v191_v31 }
 0x221   :  { %290 = vpow2.f32 %v194_v32 }
 0x222   :  { %292 = vpow2.f32 %v174_v35 }
 0x223   :  { %294 = vpow2.f32 %v176_v36 }
 0x227   :  { %v289_v33 = vpop.eup %288 }
 0x228   :  { %196 = vadd.xlane.f32.xlu0 %v289_v33 }
 0x22b   :  { %v291_v34 = vpop.eup %290 }
 0x22c   :  { %198 = vadd.xlane.f32.xlu1 %v291_v34  ;;  %v293_v37 = vpop.eup %292 }
 0x22d   :  { %v178_v39 = vmul.f32 %v293_v37, %v170_v38  ;;  %v295_v40 = vpop.eup %294 }
 0x22e   :  { %v179_v44 = vmul.f32 %v295_v40, %v171_v42 }
 0x2b5   :  { %v197_v41 = vpop.xlane.xlu0 %196 }
 0x2b6   :  { %v200_v43 = vadd.f32 %v197_v41, %v178_v39 }
 0x2b8   :  { %203 = vst.msk [vmem:[#allocation3] sm:$0xff] %vm157_vm1, %v200_v43 }
 0x2b9   :  { %v199_v45 = vpop.xlane.xlu1 %198 }
 0x2ba   :  { %v201_v46 = vadd.f32 %v199_v45, %v179_v44 }
 0x2bc   :  { %204 = vst.msk [vmem:[#allocation3 + $0x8] sm:$0xff] %vm157_vm1, %v201_v46 }
 0x2bf   :  { %v212_v47 = vld [vmem:[#allocation3] sm:$0xff] }
 0x2c0   :  { %296 = vlog2.f32 %v212_v47 }
 0x2c3   :  { %v213_v48 = vld [vmem:[#allocation3 + $0x8] sm:$0xff] }
 0x2c4   :  { %298 = vlog2.f32 %v213_v48 }
 0x2ca   :  { %v297_v49 = vpop.eup %296 }
 0x2cb   :  { %v215_v50 = vmul.f32 0.6931472, %v297_v49 }
 0x2cd   :  { %v218_v52 = vadd.f32 %v215_v50, %v210_v51 }
 0x2ce   :  { %v299_v53 = vpop.eup %298 }
 0x2cf   :  { %220 = vst.msk [vmem:[%s400_s4] sm:$0xff] %vm157_vm1, %v218_v52  ;;  %v217_v54 = vmul.f32 0.6931472, %v299_v53 }
 0x2d1   :  { %v219_v56 = vadd.f32 %v217_v54, %v211_v55 }
 0x2d3   :  { %221 = vst.msk [vmem:[%s400_s4 + $0x8] sm:$0xff] %vm157_vm1, %v219_v56 }
 0x2d4   :  { %230 = vsyncpa [#allocation5], 1 }

</bundles_post_ra>
